<compile_context>
chip_gen: v7x
topology: tpu7x:2x2x1
jax: 0.10.0
libtpu: 0.0.40
codegen_flags: <defaults>
</compile_context>

<pallas_src>
import numpy as np
import jax
import jax.numpy as jnp
from jax.experimental import pallas as pl
from jax.experimental.pallas import tpu as pltpu


_LANE = 128
_VMEM_LIMIT_BYTES = 32 * 1024 * 1024    # scoped-VMEM limit handed to Mosaic (safe on v5e/v6e/v7x)
_VMEM_BUDGET_BYTES = 28 * 1024 * 1024   # target live footprint (dbl-buffered x/out/scale/bias)
_MIN_PALLAS_BYTES = 1 << 20             # below this a fused XLA elementwise op is strictly faster


def _normalize_kernel(scale_ref, bias_ref, x_ref, o_ref):
    # scale_ref / bias_ref: (row_tile, 1) f32, broadcast along lanes.
    # x_ref / o_ref:        (row_tile, col_tile); single VPU multiply-add per vreg.
    x = x_ref[...].astype(jnp.float32)
    o_ref[...] = (x * scale_ref[...] + bias_ref[...]).astype(o_ref.dtype)


def _sublane(itemsize: int) -> int:
    # Native sublane packing: f32 -> 8 rows per vreg, bf16/f16 -> 16, int8/fp8 -> 32.
    return max(8, 32 // max(1, itemsize))


def _choose_tiles(rows, cols, itemsize):
    """Pick (row_tile, col_tile) for the (rows, cols) streaming FMA.

    Returns None if no legal tiling fits the VMEM budget (caller falls back to jnp).
    """
    sub = _sublane(itemsize)

    def per_row_live(ct):
        # Double-buffered bytes of live VMEM contributed by one row:
        #   x block + out block, plus scale & bias blocks ((row,1) f32 pads to 128 lanes).
        return 2 * (2 * ct * itemsize + 2 * _LANE * 4)

    # --- column (lane) tile ---
    if cols % _LANE == 0:
        max_cols = (_VMEM_BUDGET_BYTES // (2 * sub) - 2 * _LANE * 4) // (2 * itemsize)
        max_cols = max(_LANE, (max_cols // _LANE) * _LANE)
        col_tile = int(min(cols, max_cols))
    else:
        # Non-128-multiple last dim: the only legal lane block is the full extent.
        col_tile = cols
        if sub * per_row_live(cols) > _VMEM_BUDGET_BYTES:
            return None

    # --- row (sublane) tile ---
    max_rows = max(sub, (_VMEM_BUDGET_BYTES // per_row_live(col_tile)) // sub * sub)
    row_tile = rows if rows <= max_rows else max_rows

    # --- megacore: make sure at least one parallel axis has >= 2 grid steps ---
    if row_tile >= rows and col_tile >= cols:
        if rows >= 2 * sub:
            row_tile = max(sub, pl.cdiv(pl.cdiv(rows, 2), sub) * sub)
        elif cols % _LANE == 0 and cols >= 2 * _LANE:
            col_tile = max(_LANE, pl.cdiv(pl.cdiv(cols, 2), _LANE) * _LANE)

    return int(row_tile), int(col_tile)


def _validate_std_host(std):
    """Best-effort host-side std==0 check (skipped for traced values; no device sync)."""
    try:
        std_np = np.asarray(std, dtype=np.float64)
    except Exception:
        return
    if np.any(std_np == 0):
        raise ValueError("std evaluated to zero, leading to division by zero.")


def _normalize_jnp(x, scale_c, bias_c):
    """Fused XLA elementwise fallback (small tensors / untileable shapes)."""
    shp = (scale_c.shape[0], 1, 1)
    out = x.astype(jnp.float32) * scale_c.reshape(shp) + bias_c.reshape(shp)
    return out.astype(x.dtype)


def normalize_pallas(x, mean, std, inplace: bool = False, *, force_pallas: bool = False):
    """Normalize a (..., C, H, W) floating-point image tensor per channel."""
    x = jnp.asarray(x)
    if x.ndim < 3:
        raise ValueError(
            "Expected tensor to be a tensor image of size (..., C, H, W). "
            "Got shape {}.".format(x.shape)
        )
    dtype = x.dtype
    if not jnp.issubdtype(dtype, jnp.floating):
        raise TypeError(
            "Only floating-point tensor images are supported. Got {}.".format(dtype)
        )
    _validate_std_host(std)

    *lead, C, H, W = x.shape
    B = int(np.prod(lead)) if lead else 1

    # Fold (mean, std) into an f32 scale/bias FMA (computed once, tiny).
    mean32 = jnp.asarray(mean, jnp.float32)
    std32 = jnp.asarray(std, jnp.float32)
    if mean32.ndim == 0:
        mean32 = jnp.broadcast_to(mean32, (C,))
    if std32.ndim == 0:
        std32 = jnp.broadcast_to(std32, (C,))
    scale_c = 1.0 / std32            # (C,)
    bias_c = -mean32 * scale_c       # (C,)

    itemsize = jnp.dtype(dtype).itemsize
    n_bytes = x.size * itemsize
    rows, cols = B * C, H * W

    tiles = _choose_tiles(rows, cols, itemsize)
    if tiles is None or (n_bytes < _MIN_PALLAS_BYTES and not force_pallas):
        # TODO(synk): ideally this standalone HBM-bound FMA would be fused into the
        # producer/consumer op; the jnp path lets XLA do that for small tensors.
        return _normalize_jnp(x, scale_c, bias_c)

    row_tile, col_tile = tiles
    x2 = x.reshape(rows, cols)                                         # pure reshape
    scale = jnp.broadcast_to(scale_c[None, :], (B, C)).reshape(rows, 1)
    bias = jnp.broadcast_to(bias_c[None, :], (B, C)).reshape(rows, 1)

    grid = (pl.cdiv(rows, row_tile), pl.cdiv(cols, col_tile))
    cost = pl.CostEstimate(
        flops=2 * x.size,
        transcendentals=0,
        bytes_accessed=2 * n_bytes,
    )

    out2 = pl.pallas_call(
        _normalize_kernel,
        out_shape=jax.ShapeDtypeStruct((rows, cols), dtype),
        grid_spec=pltpu.PrefetchScalarGridSpec(
            num_scalar_prefetch=0,
            grid=grid,
            in_specs=[
                pl.BlockSpec((row_tile, 1), lambda i, j: (i, 0)),          # scale
                pl.BlockSpec((row_tile, 1), lambda i, j: (i, 0)),          # bias
                pl.BlockSpec((row_tile, col_tile), lambda i, j: (i, j)),   # x
            ],
            out_specs=pl.BlockSpec((row_tile, col_tile), lambda i, j: (i, j)),
        ),
        compiler_params=pltpu.CompilerParams(
            dimension_semantics=("parallel", "parallel"),
            vmem_limit_bytes=_VMEM_LIMIT_BYTES,
        ),
        cost_estimate=cost,
        input_output_aliases=({2: 0} if inplace else {}),
    )(scale, bias, x2)

    return out2.reshape(x.shape)


class Normalize:
    """JAX/Pallas equivalent of the PyTorch Normalize module."""

    def __init__(self, mean, std, inplace=False):
        self.mean = mean
        self.std = std
        self.inplace = inplace

    def __call__(self, tensor):
        return normalize_pallas(tensor, self.mean, self.std, self.inplace)

    def __repr__(self):
        return "Normalize(mean={0}, std={1})".format(self.mean, self.std)


if __name__ == "__main__":
    key = jax.random.PRNGKey(0)
    B, C, H, W = 2, 4, 16, 16
    x = jax.random.uniform(key, (B, C, H, W), dtype=jnp.float32)

    mean = [0.485, 0.456, 0.406, 0.5]
    std = [0.229, 0.224, 0.225, 0.25]
    mean_a = jnp.asarray(mean, jnp.float32)[None, :, None, None]
    std_a = jnp.asarray(std, jnp.float32)[None, :, None, None]
    ref = (x - mean_a) / std_a

    # 1) Module path (auto: small tensor -> fused XLA elementwise fallback).
    mod = Normalize(mean, std)
    out_auto = jax.block_until_ready(mod(x))
    assert out_auto.shape == x.shape and out_auto.dtype == x.dtype
    assert jnp.allclose(out_auto, ref, rtol=1e-5, atol=1e-5)

    # 2) Forced Pallas path, f32 (exercises kernel + >=2-step parallel grid axis).
    out_pl = jax.block_until_ready(normalize_pallas(x, mean, std, force_pallas=True))
    assert out_pl.shape == x.shape and out_pl.dtype == x.dtype
    assert jnp.allclose(out_pl, ref, rtol=1e-5, atol=1e-5)

    # 3) Forced Pallas path with input/output aliasing (inplace semantics hint).
    out_ip = jax.block_until_ready(
        normalize_pallas(x, mean, std, inplace=True, force_pallas=True)
    )
    assert jnp.allclose(out_ip, ref, rtol=1e-5, atol=1e-5)

    # 4) bf16 input: dtype-aware sublane handling.
    x_bf = x.astype(jnp.bfloat16)
    out_bf = jax.block_until_ready(normalize_pallas(x_bf, mean, std, force_pallas=True))
    ref_bf = (x_bf.astype(jnp.float32) - mean_a) / std_a
    assert out_bf.dtype == jnp.bfloat16
    assert jnp.allclose(out_bf.astype(jnp.float32), ref_bf, rtol=2e-2, atol=2e-2)

    # 5) Last dim not a multiple of 128 (H*W = 320): full-extent lane block path.
    x_odd = jax.random.uniform(jax.random.PRNGKey(0), (B, C, 16, 20), dtype=jnp.float32)
    out_odd = jax.block_until_ready(normalize_pallas(x_odd, mean, std, force_pallas=True))
    ref_odd = (x_odd - mean_a) / std_a
    assert jnp.allclose(out_odd, ref_odd, rtol=1e-5, atol=1e-5)

    print("KERNEL_OK")
</pallas_src>

<mosaic_0001>
module attributes {stable_mosaic.version = 11 : i64} {
  func.func @_normalize_kernel(%arg0: i32, %arg1: i32, %arg2: memref<8x1xf32, #tpu.memory_space<vmem>>, %arg3: memref<8x1xf32, #tpu.memory_space<vmem>>, %arg4: memref<8x128xf32, #tpu.memory_space<vmem>>, %arg5: memref<8x128xf32, #tpu.memory_space<vmem>>) attributes {dimension_semantics = [#tpu.dimension_semantics<parallel>, #tpu.dimension_semantics<parallel>], iteration_bounds = array<i64: 1, 2>, scalar_prefetch = 0 : i64, scratch_operands = 0 : i64, tpu.core_type = #tpu.core_type<tc>, window_params = [{transform_indices = @transform_0, window_bounds = array<i64: 8, 1>}, {transform_indices = @transform_1, window_bounds = array<i64: 8, 1>}, {transform_indices = @transform_2, window_bounds = array<i64: 8, 128>}, {transform_indices = @transform_3, window_bounds = array<i64: 8, 128>}]} {
    %c0 = arith.constant 0 : index
    %c0_0 = arith.constant 0 : index
    %0 = vector.load %arg4[%c0, %c0_0] : memref<8x128xf32, #tpu.memory_space<vmem>>, vector<8x128xf32>
    %c0_1 = arith.constant 0 : index
    %c0_2 = arith.constant 0 : index
    %1 = vector.load %arg2[%c0_1, %c0_2] : memref<8x1xf32, #tpu.memory_space<vmem>>, vector<8x1xf32>
    %2 = vector.broadcast %1 : vector<8x1xf32> to vector<8x128xf32>
    %3 = arith.mulf %0, %2 : vector<8x128xf32>
    %c0_3 = arith.constant 0 : index
    %c0_4 = arith.constant 0 : index
    %4 = vector.load %arg3[%c0_3, %c0_4] : memref<8x1xf32, #tpu.memory_space<vmem>>, vector<8x1xf32>
    %5 = vector.broadcast %4 : vector<8x1xf32> to vector<8x128xf32>
    %6 = arith.addf %3, %5 : vector<8x128xf32>
    %c0_5 = arith.constant 0 : index
    %c0_6 = arith.constant 0 : index
    %7 = vector.load %arg5[%c0_5, %c0_6] : memref<8x128xf32, #tpu.memory_space<vmem>>, vector<8x128xf32>
    tpu.vector_store %arg5[%c0_5, %c0_6], %6 {strides = array<i32>} : memref<8x128xf32, #tpu.memory_space<vmem>>, vector<8x128xf32>,
    return
  }
  func.func @transform_0(%arg0: i32, %arg1: i32) -> (i32, i32) {
    %c0_i32 = arith.constant 0 : i32
    %c0_i32_0 = arith.constant 0 : i32
    return %arg0, %c0_i32 : i32, i32
  }
  func.func @transform_1(%arg0: i32, %arg1: i32) -> (i32, i32) {
    %c0_i32 = arith.constant 0 : i32
    %c0_i32_0 = arith.constant 0 : i32
    return %arg0, %c0_i32 : i32, i32
  }
  func.func @transform_2(%arg0: i32, %arg1: i32) -> (i32, i32) {
    %c0_i32 = arith.constant 0 : i32
    return %arg0, %arg1 : i32, i32
  }
  func.func @transform_3(%arg0: i32, %arg1: i32) -> (i32, i32) {
    %c0_i32 = arith.constant 0 : i32
    return %arg0, %arg1 : i32, i32
  }
}

</mosaic_0001>

<bundles_post_ra>
// kernel: tpu_custom_call.1
= control target key start
LH: loop header
LB: loop body
LE: loop exit
PB: predicated region body
PF: predicated region fallthrough
CT: control target
= control target key end

     0   :  { %8 = vsyncpa [#allocation3], 0  ;;  %s655_s0 = inlined_call_operand.vmem [shape: f32[8,1], index: 0, kind: input, shape index: {}]   ;;  %s656_s1 = inlined_call_operand.vmem [shape: f32[8,1], index: 1, kind: input, shape index: {}]   ;;  %s657_s2 = inlined_call_operand.vmem [shape: f32[8,256], index: 2, kind: input, shape index: {}]   ;;  %s658_s3 = inlined_call_operand.hbm [shape: f32[8,256], index: 3, kind: output, shape index: {}]  }
   0x1   :  { %10 = vsyncpa [#allocation3 + $0x1], 0  ;;  %s537_s12 = smov 0   ;;  %s539_s13 = smov 0  }
   0x2   :  { %s541_s14 = smov 0   ;;  %s543_s15 = smov 0  }
   0x3   :  { %s545_s16 = smov 0   ;;  %s547_s17 = smov 0  }
   0x4 LB: > { %s365_s18 = sadd.s32 4294967295, %s513_s17   ;;  %s366_s19 = sadd.s32 4294967294, %s513_s17   ;;  %s513_s17 = sphi %s547_s17, %s16_s17   ;;  %s509_s16 = sphi %s545_s16, %s665_s16   ;;  %s505_s15 = sphi %s543_s15, %s664_s15   ;;  %s501_s14 = sphi %s541_s14, %s663_s14   ;;  %s497_s13 = sphi %s539_s13, %s662_s13   ;;  %s493_s12 = sphi %s537_s12, %s661_s12  }
   0x5   : > { %s25_s20 = sadd.s32 1, %s509_s16  ;;  %s117_s21 = sadd.s32 1, %s501_s14 }
   0x6   : > { %p26_p0 = scmp.ge.s32.totalorder %s25_s20, 2  ;;  %p127_p1 = scmp.ne.s32.totalorder %s501_s14, %s497_s13 }
   0x7   : > { %p128_p2 = scmp.eq.s32.totalorder %s365_s18, 1  ;;  %p133_p3 = scmp.ne.s32.totalorder %s497_s13, %s493_s12 }
   0x8   : > { %s667_s20 = smov (%p26_p0, %s25_s20), 0  ;;  %p134_p5 = scmp.eq.s32.totalorder %s366_s19, 1 }
   0x9   : > { %p577_p4 = por %p128_p2, %p127_p1  ;;  %s113_s23 = ssub.s32 %s509_s16, %s667_s20 }
   0xa   : > { %p371_p6 = scmp.ge.s32.totalorder %s513_s17, 1  ;;  %p115_p7 = scmp.eq.s32.totalorder %s113_s23, 0 }
   0xb   : > { %p584_p8 = por %p134_p5, %p133_p3  ;;  %p177_p9 = scmp.lt.s32.totalorder %s513_s17, 3 }
   0xc   : > { %s590_s25 = scalar_select %p115_p7, %s501_s14, %s117_s21  }
   0xd   : > { %p178_p10 = pnand %p371_p6, %p177_p9 }
   0xe   : > { %v229_v0 = vld [vmem:[%s655_s0] sm:$0xff] (!%p178_p10)  ;;  %v515_v1 = vmov (!%p178_p10), 0   ;;  %p222_p11 = scmp.lt.s32.totalorder (!%p178_p10), %s505_s15, 1  ;;  %s209_s4 = sand.u32 (!%p178_p10), 1, %s497_s13  }
   0xf   : > { %181 = sbr.rel (%p178_p10) target bundleno = 164 (0xa4), region = 32  ;;  %434 = vset.pattern.permute.xlu0 (!%p178_p10), %v515_v1  ;;  %v236_v2 = vld [vmem:[%s656_s1] sm:$0xff] (!%p178_p10)  ;;  %s372_s6 = sshll.u32 (!%p178_p10), %s209_s4, 3 }
  0x10   : > { %232 = vperm.xlu0 (!%p178_p10), %434, %v229_v0   ;;  %s375_s10 = sshll.u32 (!%p178_p10), %s505_s15, 7  ;;  %s211_s11 = scalar_lea.vmem (!%p178_p10), [#allocation2], %s372_s6 }
  0x11   : > { %s260_s18 = sshll.u32 (!%p178_p10), %s211_s11, 4  ;;  %s608_s23 = scalar_lea.hbm (!%p178_p10), %s658_s3, %s375_s10  ;;  %s610_s18 = int_to_ptr.vmem [resolvable:$true] %s260_s18 }
  0x12   : > { %s245_s26 = scalar_lea.sflag (!%p178_p10), [#allocation3], %s209_s4  ;;  %s435_s27 = scalar_lea.vmem (!%p178_p10), %s610_s18, 128 }
  0x13   : > { %p436_p12 = scmp.ne.s32.totalorder (!%p178_p10), %s610_s18, %s435_s27 }
  0x14   : > { %239 = vperm.xlu0 (!%p178_p10), %434, %v236_v2  }
  0x15   : > { %p437_p13 = pnand (!%p178_p10), %p436_p12, %p577_p4 }
  0x16   : > { %s223_s30 = scalar_select %p222_p11, %s505_s15, 1 }
  0x17   : > { %p438_p0 = pneg %p437_p13  ;;  %s516_s15 = smov [#allocation2]  }
  0x18   : > { %s373_s5 = sshll.u32 %s223_s30, 3  ;;  %s439_s28 = sshll.u32 %s516_s15, 4  ;;  %s440_s28 = int_to_ptr.vmem [resolvable:$false] %s439_s28 }
  0x19   : > { %s227_s9 = scalar_lea.vmem %s657_s2, %s373_s5  ;;  %s441_s29 = scalar_lea.vmem %s440_s28, 256 }
  0x1a   : > { %v228_v4 = vld [vmem:[%s227_s9] sm:$0xff]  ;;  %p442_p1 = scmp.lt.s32.totalorder %s610_s18, %s440_s28  ;;  %p443_p2 = scmp.lt.s32.totalorder %s441_s29, %s435_s27 }
  0x1c   : > { %p444_p3 = por %p443_p2, %p442_p1 }
  0x1e   : > { %p445_p5 = pnand %p444_p3, %p438_p0 }
  0x8f   : > { %v233_v3 = vpop.permute.xlu0 %232 }
  0x90   : > { %v235_v5 = vmul.f32 %v233_v3, %v228_v4 }
  0x93   : > { %v240_v6 = vpop.permute.xlu0 %239 }
  0x94   : > { %v242_v7 = vadd.f32 %v240_v6, %v235_v5 }
  0x96   : > { %243 = vst [vmem:[%s211_s11] sm:$0xff] %v242_v7 }
  0x97   : > { %448 = shalt.err (!%p445_p5)
}
  0x98   : > { %s449_s30 = scalar_lea.hbm %s608_s23, 128  ;;  %s453_s6 = scalar_lea.hbm %s658_s3, 256 }
  0x99   : > { %p450_p6 = scmp.ne.s32.totalorder %s608_s23, %s449_s30  ;;  %p454_p10 = scmp.lt.u32.totalorder %s608_s23, %s658_s3 }
  0x9a   : > { %p455_p11 = scmp.lt.u32.totalorder %s453_s6, %s449_s30  ;;  %p457_p13 = scmp.lt.u32.totalorder %s449_s30, %s608_s23 }
  0x9b   : > { %p451_p7 = pnand %p450_p6, %p577_p4 }
  0x9c   : > { %p456_p12 = por %p455_p11, %p454_p10 }
  0x9d   : > { %p452_p9 = pneg %p451_p7 }
  0x9e   : > { %p458_p0 = por %p457_p13, %p456_p12 }
  0xa0   : > { %p459_p1 = pnand %p458_p0, %p452_p9 }
  0xa2   : > { %462 = shalt.err (!%p459_p1)
}
  0xa3   : > { %378 = dma.vmem_to_hbm [thread:$0]  (%p577_p4), %s610_s18, 128, %s608_s23, %s245_s26  }
  0xa4 PF: > { %p384_p2 = scmp.ge.s32.totalorder %s513_s17, 2  ;;  %s272_s9 = sand.u32 1, %s493_s12  }
  0xa5   : > { %s273_s10 = scalar_lea.sflag [#allocation3], %s272_s9 }
  0xa6   : > { %p381_p3 = pnand %p384_p2, %p584_p8 }
  0xa8   : > { %488 = dma.done.wait (!%p381_p3), %s273_s10, 128  }
  0xa9   : > { %490 = vsyncadd (!%p381_p3), %s273_s10, 4294967168  ;;  %s16_s17 = sadd.s32 1, %s513_s17   ;;  %s661_s12 = smov %s497_s13 }
  0xaa   : > { %p13_p5 = scmp.ge.s32.totalorder %s16_s17, 4   ;;  %s662_s13 = smov %s501_s14 }
  0xab   : > { %s663_s14 = smov %s590_s25  ;;  %s664_s15 = smov %s509_s16 }
  0xac   : > { %s665_s16 = smov %s667_s20  ;;  %15 = sbr.rel (!%p13_p5) target bundleno = 4 (0x4), region = 73 }
  0xb3   :  { %278 = vsyncpa [#allocation3], 1 }
  0xb4   :  { %280 = vsyncpa [#allocation3 + $0x1], 1 }

</bundles_post_ra>
